<compile_context>
chip_gen: v7x
topology: tpu7x:2x2x1
jax: 0.10.0
libtpu: 0.0.40
codegen_flags: <defaults>
</compile_context>

<pallas_src>
import functools

import jax
import jax.numpy as jnp
from jax.experimental import pallas as pl
from jax.experimental.pallas import tpu as pltpu

NORM_CLAMP = 2.0 ** (-24)          # NormSE3.NORM_CLAMP
GN_EPS = 1e-5                      # nn.GroupNorm default eps
_VMEM_LIMIT_BYTES = 32 * 1024 * 1024


def _round_up(x, m):
    return ((x + m - 1) // m) * m


def _norm_se3_kernel(degrees, channels, *refs):
    """One tile of TN nodes; nodes live on the 128-wide lane axis.

    refs layout (D = len(degrees)):
      refs[0:D]       per-degree features, shape ((2d+1)*C, TN), rep-major rows
                      (row = m*C + c for rep component m, channel c)
      refs[D]         gamma, shape (C, D)   -- GroupNorm weight, column i = degree i
      refs[D+1]       beta,  shape (C, D)   -- GroupNorm bias
      refs[D+2:2D+2]  per-degree outputs, shape ((2d+1)*C, TN)
    """
    D = len(degrees)
    C = channels
    x_refs = refs[:D]
    gamma = refs[D][...].astype(jnp.float32)     # (C, D), loaded once per step
    beta = refs[D + 1][...].astype(jnp.float32)  # (C, D)
    out_refs = refs[D + 2:]

    for i, d in enumerate(degrees):
        dim = 2 * d + 1
        xf = x_refs[i][...].astype(jnp.float32)            # ((2d+1)*C, TN)
        xsq = xf * xf

        # Per-channel L2 norm over the 2d+1 representation components:
        # static sublane slices + adds (cheap filler; kernel is HBM-bound).
        sumsq = xsq[0:C, :]
        for m in range(1, dim):
            sumsq = sumsq + xsq[m * C:(m + 1) * C, :]
        sumsq = jnp.maximum(sumsq, NORM_CLAMP * NORM_CLAMP)
        inv_norm = jax.lax.rsqrt(sumsq)                    # EUP slot
        norm = sumsq * inv_norm                            # == clamp(||x||, NORM_CLAMP)

        # GroupNorm: each degree is one group of C channels (per-node stats).
        mean = jnp.mean(norm, axis=0, keepdims=True)       # (1, TN)
        centered = norm - mean
        var = jnp.mean(centered * centered, axis=0, keepdims=True)
        gn = centered * jax.lax.rsqrt(var + GN_EPS)
        gn = gn * gamma[:, i:i + 1] + beta[:, i:i + 1]

        # ReLU on normalized norms, rescale the phase: out = x / ||x|| * new_norm.
        scale = jnp.maximum(gn, 0.0) * inv_norm            # (C, TN)
        if dim > 1:
            scale = jnp.concatenate([scale] * dim, axis=0)  # rep-major tiling
        out_refs[i][...] = (xf * scale).astype(out_refs[i].dtype)


@functools.partial(jax.jit, static_argnames=("degrees", "channels", "tile_n"))
def _norm_se3_call(xs, gamma, beta, *, degrees, channels, tile_n):
    """xs: tuple of per-degree arrays, each ((2d+1)*C, N); N need not be tile-aligned."""
    D = len(degrees)
    C = channels
    dims = [2 * d + 1 for d in degrees]
    n = xs[0].shape[-1]
    grid = (pl.cdiv(n, tile_n),)                           # ragged last block is fine

    feat_in_specs = [
        pl.BlockSpec((dims[i] * C, tile_n), lambda g: (0, g)) for i in range(D)
    ]
    const_spec = pl.BlockSpec((C, D), lambda g: (0, 0))
    out_specs = tuple(
        pl.BlockSpec((dims[i] * C, tile_n), lambda g: (0, g)) for i in range(D)
    )
    out_shape = tuple(
        jax.ShapeDtypeStruct((dims[i] * C, n), xs[i].dtype) for i in range(D)
    )

    kernel = functools.partial(_norm_se3_kernel, degrees, C)
    return pl.pallas_call(
        kernel,
        out_shape=out_shape,
        grid_spec=pltpu.PrefetchScalarGridSpec(
            num_scalar_prefetch=0,
            grid=grid,
            in_specs=feat_in_specs + [const_spec, const_spec],
            out_specs=out_specs,
        ),
        compiler_params=pltpu.CompilerParams(
            dimension_semantics=("parallel",),
            vmem_limit_bytes=_VMEM_LIMIT_BYTES,
        ),
    )(*xs, gamma, beta)


def _pick_tile_n(n, dims, channels, itemsize, tile_n=None,
                 vmem_budget_bytes=24 * 1024 * 1024, max_tile=8192):
    """Largest node tile (multiple of 128) whose double-buffered in+out footprint
    stays under the VMEM budget (safe on v5e/v6e/v7x with a 32 MiB scoped limit)."""
    if tile_n is None:
        rows = sum(_round_up(d * channels, 8) for d in dims)   # sublane-padded rows
        per_node = rows * itemsize * 2 * 2                     # in+out, double-buffered
        tile_n = max(128, vmem_budget_bytes // max(per_node, 1))
        tile_n = min(tile_n, max_tile)
    tile_n = max(128, (int(tile_n) // 128) * 128)
    tile_n = min(tile_n, _round_up(n, 128))
    return int(tile_n)


def norm_se3_apply(xs, gamma2, beta2, degrees, channels, tile_n=None):
    """Fast path: node-last packed layout, zero wrapper-side layout conversion.

    xs     : tuple of per-degree arrays, each ((2d+1)*C, N), rep-major rows
    gamma2 : (C, D) GroupNorm weight (column i = degree i)
    beta2  : (C, D) GroupNorm bias
    """
    degrees = tuple(sorted(int(d) for d in degrees))
    dims = [2 * d + 1 for d in degrees]
    n = xs[0].shape[-1]
    itemsize = jnp.dtype(xs[0].dtype).itemsize
    tile = _pick_tile_n(n, dims, channels, itemsize, tile_n)
    return _norm_se3_call(tuple(xs), gamma2, beta2,
                          degrees=degrees, channels=int(channels), tile_n=tile)


def norm_se3_forward(features, gamma, beta, degrees, channels, tile_n=None):
    """NormSE3 forward (GroupNorm path; all degrees share `channels` multiplicity).

    features : dict {str(d): (N, C, 2d+1)} arrays (module-compatible layout)
    gamma    : (D*C,) GroupNorm weight (degree-blocked channel order)
    beta     : (D*C,) GroupNorm bias

    The only wrapper-side data movement is one transpose per degree each way.
    # TODO(synk): have the surrounding model keep the node-last ((2d+1)*C, N)
    # layout end-to-end and call norm_se3_apply directly to remove them.
    """
    degrees = tuple(sorted(int(d) for d in degrees))
    D, C = len(degrees), int(channels)
    N = features[str(degrees[0])].shape[0]

    xs = []
    for d in degrees:
        dim = 2 * d + 1
        f = features[str(d)]                                 # (N, C, 2d+1)
        assert f.shape[1] == C and f.shape[2] == dim
        # (N, C, dim) -> (dim, C, N) -> (dim*C, N); the reshape is a free merge.
        xs.append(jnp.transpose(f, (2, 1, 0)).reshape(dim * C, N))

    gamma2 = jnp.asarray(gamma, jnp.float32).reshape(D, C).T   # (C, D)
    beta2 = jnp.asarray(beta, jnp.float32).reshape(D, C).T     # (C, D)

    outs = norm_se3_apply(tuple(xs), gamma2, beta2, degrees, C, tile_n=tile_n)

    result = {}
    for i, d in enumerate(degrees):
        dim = 2 * d + 1
        o = outs[i].reshape(dim, C, N)                        # free split
        result[str(d)] = jnp.transpose(o, (2, 1, 0))          # back to (N, C, 2d+1)
    return result


def norm_se3_reference(features, gamma, beta, degrees, channels):
    """Pure-JAX mirror of the PyTorch module (for correctness check)."""
    degrees = sorted(int(d) for d in degrees)
    D, C = len(degrees), channels
    norms = [jnp.maximum(jnp.linalg.norm(features[str(d)], axis=-1, keepdims=True),
                         NORM_CLAMP) for d in degrees]
    fused = jnp.concatenate(norms, axis=-2)[..., 0]          # (N, D*C)
    g = fused.reshape(-1, D, C)
    mean = jnp.mean(g, axis=-1, keepdims=True)
    var = jnp.mean((g - mean) ** 2, axis=-1, keepdims=True)
    gn = ((g - mean) / jnp.sqrt(var + GN_EPS)).reshape(-1, D * C)
    gn = gn * jnp.asarray(gamma)[None, :] + jnp.asarray(beta)[None, :]
    new_norms = jnp.maximum(gn, 0.0).reshape(-1, D * C, 1)
    out = {}
    for i, d in enumerate(degrees):
        nn_d = new_norms[:, i * C:(i + 1) * C, :]
        out[str(d)] = features[str(d)] / norms[i] * nn_d
    return out


if __name__ == "__main__":
    key = jax.random.PRNGKey(0)
    N, C = 300, 4                  # nodes (not a multiple of the tile), channels
    degrees = (0, 1, 2)            # Fiber.create(num_degrees=3, num_channels=4)

    feats = {}
    for d in degrees:
        key, sk = jax.random.split(key)
        feats[str(d)] = jax.random.normal(sk, (N, C, 2 * d + 1), dtype=jnp.float32)

    DC = len(degrees) * C
    key, k1, k2 = jax.random.split(key, 3)
    gamma = 1.0 + 0.1 * jax.random.normal(k1, (DC,), dtype=jnp.float32)
    beta = 0.05 * jax.random.normal(k2, (DC,), dtype=jnp.float32)

    # tile_n=128 forces multiple grid steps plus a ragged tail at this small N;
    # production sizes use the VMEM-budgeted auto tile (up to 8192 nodes/step).
    out = norm_se3_forward(feats, gamma, beta, degrees, C, tile_n=128)
    for v in out.values():
        jax.block_until_ready(v)

    ref = norm_se3_reference(feats, gamma, beta, degrees, C)
    for d in degrees:
        assert jnp.allclose(out[str(d)], ref[str(d)], atol=1e-5, rtol=1e-4), \
            f"degree {d} mismatch"

    print("KERNEL_OK")
</pallas_src>

<mosaic_0001>
module attributes {stable_mosaic.version = 11 : i64} {
  func.func @_norm_se3_kernel(%arg0: i32, %arg1: memref<4x128xf32, #tpu.memory_space<vmem>>, %arg2: memref<12x128xf32, #tpu.memory_space<vmem>>, %arg3: memref<20x128xf32, #tpu.memory_space<vmem>>, %arg4: memref<4x3xf32, #tpu.memory_space<vmem>>, %arg5: memref<4x3xf32, #tpu.memory_space<vmem>>, %arg6: memref<4x128xf32, #tpu.memory_space<vmem>>, %arg7: memref<12x128xf32, #tpu.memory_space<vmem>>, %arg8: memref<20x128xf32, #tpu.memory_space<vmem>>) attributes {dimension_semantics = [#tpu.dimension_semantics<parallel>], iteration_bounds = array<i64: 3>, scalar_prefetch = 0 : i64, scratch_operands = 0 : i64, tpu.core_type = #tpu.core_type<tc>, window_params = [{transform_indices = @transform_0, window_bounds = array<i64: 4, 128>}, {transform_indices = @transform_1, window_bounds = array<i64: 12, 128>}, {transform_indices = @transform_2, window_bounds = array<i64: 20, 128>}, {pipeline_mode = #tpu.pipeline_mode<synchronous>, transform_indices = @transform_3, window_bounds = array<i64: 4, 3>}, {pipeline_mode = #tpu.pipeline_mode<synchronous>, transform_indices = @transform_4, window_bounds = array<i64: 4, 3>}, {transform_indices = @transform_5, window_bounds = array<i64: 4, 128>}, {transform_indices = @transform_6, window_bounds = array<i64: 12, 128>}, {transform_indices = @transform_7, window_bounds = array<i64: 20, 128>}]} {
    %c0 = arith.constant 0 : index
    %c0_0 = arith.constant 0 : index
    %0 = vector.load %arg4[%c0, %c0_0] : memref<4x3xf32, #tpu.memory_space<vmem>>, vector<4x3xf32>
    %c0_1 = arith.constant 0 : index
    %c0_2 = arith.constant 0 : index
    %1 = vector.load %arg5[%c0_1, %c0_2] : memref<4x3xf32, #tpu.memory_space<vmem>>, vector<4x3xf32>
    %c0_3 = arith.constant 0 : index
    %c0_4 = arith.constant 0 : index
    %2 = vector.load %arg1[%c0_3, %c0_4] : memref<4x128xf32, #tpu.memory_space<vmem>>, vector<4x128xf32>
    %3 = arith.mulf %2, %2 : vector<4x128xf32>
    %cst = arith.constant 3.55271368E-15 : f32
    %4 = vector.broadcast %cst : f32 to vector<4x128xf32>
    %5 = arith.maximumf %3, %4 : vector<4x128xf32>
    %6 = math.rsqrt %5 : vector<4x128xf32>
    %7 = arith.mulf %5, %6 : vector<4x128xf32>
    %cst_5 = arith.constant dense<0.000000e+00> : vector<128xf32>
    %8 = vector.multi_reduction <add>, %7, %cst_5 [0] : vector<4x128xf32> to vector<128xf32>
    %9 = vector.shape_cast %8 : vector<128xf32> to vector<1x128xf32>
    %cst_6 = arith.constant 4.000000e+00 : f32
    %10 = vector.broadcast %cst_6 : f32 to vector<1x128xf32>
    %11 = arith.divf %9, %10 : vector<1x128xf32>
    %12 = vector.broadcast %11 : vector<1x128xf32> to vector<4x128xf32>
    %13 = arith.subf %7, %12 : vector<4x128xf32>
    %14 = arith.mulf %13, %13 : vector<4x128xf32>
    %cst_7 = arith.constant dense<0.000000e+00> : vector<128xf32>
    %15 = vector.multi_reduction <add>, %14, %cst_7 [0] : vector<4x128xf32> to vector<128xf32>
    %16 = vector.shape_cast %15 : vector<128xf32> to vector<1x128xf32>
    %cst_8 = arith.constant 4.000000e+00 : f32
    %17 = vector.broadcast %cst_8 : f32 to vector<1x128xf32>
    %18 = arith.divf %16, %17 : vector<1x128xf32>
    %cst_9 = arith.constant 9.99999974E-6 : f32
    %19 = vector.broadcast %cst_9 : f32 to vector<1x128xf32>
    %20 = arith.addf %18, %19 : vector<1x128xf32>
    %21 = math.rsqrt %20 : vector<1x128xf32>
    %22 = vector.broadcast %21 : vector<1x128xf32> to vector<4x128xf32>
    %23 = arith.mulf %13, %22 : vector<4x128xf32>
    %24 = vector.extract_strided_slice %0 {offsets = [0, 0], sizes = [4, 1], strides = [1, 1]} : vector<4x3xf32> to vector<4x1xf32>
    %25 = vector.broadcast %24 : vector<4x1xf32> to vector<4x128xf32>
    %26 = arith.mulf %23, %25 : vector<4x128xf32>
    %27 = vector.extract_strided_slice %1 {offsets = [0, 0], sizes = [4, 1], strides = [1, 1]} : vector<4x3xf32> to vector<4x1xf32>
    %28 = vector.broadcast %27 : vector<4x1xf32> to vector<4x128xf32>
    %29 = arith.addf %26, %28 : vector<4x128xf32>
    %cst_10 = arith.constant 0.000000e+00 : f32
    %30 = vector.broadcast %cst_10 : f32 to vector<4x128xf32>
    %31 = arith.maximumf %29, %30 : vector<4x128xf32>
    %32 = arith.mulf %31, %6 : vector<4x128xf32>
    %33 = arith.mulf %2, %32 : vector<4x128xf32>
    %c0_11 = arith.constant 0 : index
    %c0_12 = arith.constant 0 : index
    %34 = vector.load %arg6[%c0_11, %c0_12] : memref<4x128xf32, #tpu.memory_space<vmem>>, vector<4x128xf32>
    tpu.vector_store %arg6[%c0_11, %c0_12], %33 {strides = array<i32>} : memref<4x128xf32, #tpu.memory_space<vmem>>, vector<4x128xf32>,
    %c0_13 = arith.constant 0 : index
    %c0_14 = arith.constant 0 : index
    %35 = vector.load %arg2[%c0_13, %c0_14] : memref<12x128xf32, #tpu.memory_space<vmem>>, vector<12x128xf32>
    %36 = arith.mulf %35, %35 : vector<12x128xf32>
    %37 = vector.extract_strided_slice %36 {offsets = [0, 0], sizes = [4, 128], strides = [1, 1]} : vector<12x128xf32> to vector<4x128xf32>
    %38 = vector.extract_strided_slice %36 {offsets = [4, 0], sizes = [4, 128], strides = [1, 1]} : vector<12x128xf32> to vector<4x128xf32>
    %39 = arith.addf %37, %38 : vector<4x128xf32>
    %40 = vector.extract_strided_slice %36 {offsets = [8, 0], sizes = [4, 128], strides = [1, 1]} : vector<12x128xf32> to vector<4x128xf32>
    %41 = arith.addf %39, %40 : vector<4x128xf32>
    %cst_15 = arith.constant 3.55271368E-15 : f32
    %42 = vector.broadcast %cst_15 : f32 to vector<4x128xf32>
    %43 = arith.maximumf %41, %42 : vector<4x128xf32>
    %44 = math.rsqrt %43 : vector<4x128xf32>
    %45 = arith.mulf %43, %44 : vector<4x128xf32>
    %cst_16 = arith.constant dense<0.000000e+00> : vector<128xf32>
    %46 = vector.multi_reduction <add>, %45, %cst_16 [0] : vector<4x128xf32> to vector<128xf32>
    %47 = vector.shape_cast %46 : vector<128xf32> to vector<1x128xf32>
    %cst_17 = arith.constant 4.000000e+00 : f32
    %48 = vector.broadcast %cst_17 : f32 to vector<1x128xf32>
    %49 = arith.divf %47, %48 : vector<1x128xf32>
    %50 = vector.broadcast %49 : vector<1x128xf32> to vector<4x128xf32>
    %51 = arith.subf %45, %50 : vector<4x128xf32>
    %52 = arith.mulf %51, %51 : vector<4x128xf32>
    %cst_18 = arith.constant dense<0.000000e+00> : vector<128xf32>
    %53 = vector.multi_reduction <add>, %52, %cst_18 [0] : vector<4x128xf32> to vector<128xf32>
    %54 = vector.shape_cast %53 : vector<128xf32> to vector<1x128xf32>
    %cst_19 = arith.constant 4.000000e+00 : f32
    %55 = vector.broadcast %cst_19 : f32 to vector<1x128xf32>
    %56 = arith.divf %54, %55 : vector<1x128xf32>
    %cst_20 = arith.constant 9.99999974E-6 : f32
    %57 = vector.broadcast %cst_20 : f32 to vector<1x128xf32>
    %58 = arith.addf %56, %57 : vector<1x128xf32>
    %59 = math.rsqrt %58 : vector<1x128xf32>
    %60 = vector.broadcast %59 : vector<1x128xf32> to vector<4x128xf32>
    %61 = arith.mulf %51, %60 : vector<4x128xf32>
    %62 = vector.extract_strided_slice %0 {offsets = [0, 1], sizes = [4, 1], strides = [1, 1]} : vector<4x3xf32> to vector<4x1xf32>
    %63 = vector.broadcast %62 : vector<4x1xf32> to vector<4x128xf32>
    %64 = arith.mulf %61, %63 : vector<4x128xf32>
    %65 = vector.extract_strided_slice %1 {offsets = [0, 1], sizes = [4, 1], strides = [1, 1]} : vector<4x3xf32> to vector<4x1xf32>
    %66 = vector.broadcast %65 : vector<4x1xf32> to vector<4x128xf32>
    %67 = arith.addf %64, %66 : vector<4x128xf32>
    %cst_21 = arith.constant 0.000000e+00 : f32
    %68 = vector.broadcast %cst_21 : f32 to vector<4x128xf32>
    %69 = arith.maximumf %67, %68 : vector<4x128xf32>
    %70 = arith.mulf %69, %44 : vector<4x128xf32>
    %71 = tpu.concatenate %70, %70, %70 in 0 : vector<4x128xf32>, vector<4x128xf32>, vector<4x128xf32> -> vector<12x128xf32>
    %72 = arith.mulf %35, %71 : vector<12x128xf32>
    %c0_22 = arith.constant 0 : index
    %c0_23 = arith.constant 0 : index
    %73 = vector.load %arg7[%c0_22, %c0_23] : memref<12x128xf32, #tpu.memory_space<vmem>>, vector<12x128xf32>
    tpu.vector_store %arg7[%c0_22, %c0_23], %72 {strides = array<i32>} : memref<12x128xf32, #tpu.memory_space<vmem>>, vector<12x128xf32>,
    %c0_24 = arith.constant 0 : index
    %c0_25 = arith.constant 0 : index
    %74 = vector.load %arg3[%c0_24, %c0_25] : memref<20x128xf32, #tpu.memory_space<vmem>>, vector<20x128xf32>
    %75 = arith.mulf %74, %74 : vector<20x128xf32>
    %76 = vector.extract_strided_slice %75 {offsets = [0, 0], sizes = [4, 128], strides = [1, 1]} : vector<20x128xf32> to vector<4x128xf32>
    %77 = vector.extract_strided_slice %75 {offsets = [4, 0], sizes = [4, 128], strides = [1, 1]} : vector<20x128xf32> to vector<4x128xf32>
    %78 = arith.addf %76, %77 : vector<4x128xf32>
    %79 = vector.extract_strided_slice %75 {offsets = [8, 0], sizes = [4, 128], strides = [1, 1]} : vector<20x128xf32> to vector<4x128xf32>
    %80 = arith.addf %78, %79 : vector<4x128xf32>
    %81 = vector.extract_strided_slice %75 {offsets = [12, 0], sizes = [4, 128], strides = [1, 1]} : vector<20x128xf32> to vector<4x128xf32>
    %82 = arith.addf %80, %81 : vector<4x128xf32>
    %83 = vector.extract_strided_slice %75 {offsets = [16, 0], sizes = [4, 128], strides = [1, 1]} : vector<20x128xf32> to vector<4x128xf32>
    %84 = arith.addf %82, %83 : vector<4x128xf32>
    %cst_26 = arith.constant 3.55271368E-15 : f32
    %85 = vector.broadcast %cst_26 : f32 to vector<4x128xf32>
    %86 = arith.maximumf %84, %85 : vector<4x128xf32>
    %87 = math.rsqrt %86 : vector<4x128xf32>
    %88 = arith.mulf %86, %87 : vector<4x128xf32>
    %cst_27 = arith.constant dense<0.000000e+00> : vector<128xf32>
    %89 = vector.multi_reduction <add>, %88, %cst_27 [0] : vector<4x128xf32> to vector<128xf32>
    %90 = vector.shape_cast %89 : vector<128xf32> to vector<1x128xf32>
    %cst_28 = arith.constant 4.000000e+00 : f32
    %91 = vector.broadcast %cst_28 : f32 to vector<1x128xf32>
    %92 = arith.divf %90, %91 : vector<1x128xf32>
    %93 = vector.broadcast %92 : vector<1x128xf32> to vector<4x128xf32>
    %94 = arith.subf %88, %93 : vector<4x128xf32>
    %95 = arith.mulf %94, %94 : vector<4x128xf32>
    %cst_29 = arith.constant dense<0.000000e+00> : vector<128xf32>
    %96 = vector.multi_reduction <add>, %95, %cst_29 [0] : vector<4x128xf32> to vector<128xf32>
    %97 = vector.shape_cast %96 : vector<128xf32> to vector<1x128xf32>
    %cst_30 = arith.constant 4.000000e+00 : f32
    %98 = vector.broadcast %cst_30 : f32 to vector<1x128xf32>
    %99 = arith.divf %97, %98 : vector<1x128xf32>
    %cst_31 = arith.constant 9.99999974E-6 : f32
    %100 = vector.broadcast %cst_31 : f32 to vector<1x128xf32>
    %101 = arith.addf %99, %100 : vector<1x128xf32>
    %102 = math.rsqrt %101 : vector<1x128xf32>
    %103 = vector.broadcast %102 : vector<1x128xf32> to vector<4x128xf32>
    %104 = arith.mulf %94, %103 : vector<4x128xf32>
    %105 = vector.extract_strided_slice %0 {offsets = [0, 2], sizes = [4, 1], strides = [1, 1]} : vector<4x3xf32> to vector<4x1xf32>
    %106 = vector.broadcast %105 : vector<4x1xf32> to vector<4x128xf32>
    %107 = arith.mulf %104, %106 : vector<4x128xf32>
    %108 = vector.extract_strided_slice %1 {offsets = [0, 2], sizes = [4, 1], strides = [1, 1]} : vector<4x3xf32> to vector<4x1xf32>
    %109 = vector.broadcast %108 : vector<4x1xf32> to vector<4x128xf32>
    %110 = arith.addf %107, %109 : vector<4x128xf32>
    %cst_32 = arith.constant 0.000000e+00 : f32
    %111 = vector.broadcast %cst_32 : f32 to vector<4x128xf32>
    %112 = arith.maximumf %110, %111 : vector<4x128xf32>
    %113 = arith.mulf %112, %87 : vector<4x128xf32>
    %114 = tpu.concatenate %113, %113, %113, %113, %113 in 0 : vector<4x128xf32>, vector<4x128xf32>, vector<4x128xf32>, vector<4x128xf32>, vector<4x128xf32> -> vector<20x128xf32>
    %115 = arith.mulf %74, %114 : vector<20x128xf32>
    %c0_33 = arith.constant 0 : index
    %c0_34 = arith.constant 0 : index
    %116 = vector.load %arg8[%c0_33, %c0_34] : memref<20x128xf32, #tpu.memory_space<vmem>>, vector<20x128xf32>
    tpu.vector_store %arg8[%c0_33, %c0_34], %115 {strides = array<i32>} : memref<20x128xf32, #tpu.memory_space<vmem>>, vector<20x128xf32>,
    return
  }
  func.func @transform_0(%arg0: i32) -> (i32, i32) {
    %c0_i32 = arith.constant 0 : i32
    %c0_i32_0 = arith.constant 0 : i32
    return %c0_i32, %arg0 : i32, i32
  }
  func.func @transform_1(%arg0: i32) -> (i32, i32) {
    %c0_i32 = arith.constant 0 : i32
    %c0_i32_0 = arith.constant 0 : i32
    return %c0_i32, %arg0 : i32, i32
  }
  func.func @transform_2(%arg0: i32) -> (i32, i32) {
    %c0_i32 = arith.constant 0 : i32
    %c0_i32_0 = arith.constant 0 : i32
    return %c0_i32, %arg0 : i32, i32
  }
  func.func @transform_3(%arg0: i32) -> (i32, i32) {
    %c0_i32 = arith.constant 0 : i32
    %c0_i32_0 = arith.constant 0 : i32
    %c0_i32_1 = arith.constant 0 : i32
    return %c0_i32, %c0_i32_0 : i32, i32
  }
  func.func @transform_4(%arg0: i32) -> (i32, i32) {
    %c0_i32 = arith.constant 0 : i32
    %c0_i32_0 = arith.constant 0 : i32
    %c0_i32_1 = arith.constant 0 : i32
    return %c0_i32, %c0_i32_0 : i32, i32
  }
  func.func @transform_5(%arg0: i32) -> (i32, i32) {
    %c0_i32 = arith.constant 0 : i32
    %c0_i32_0 = arith.constant 0 : i32
    return %c0_i32, %arg0 : i32, i32
  }
  func.func @transform_6(%arg0: i32) -> (i32, i32) {
    %c0_i32 = arith.constant 0 : i32
    %c0_i32_0 = arith.constant 0 : i32
    return %c0_i32, %arg0 : i32, i32
  }
  func.func @transform_7(%arg0: i32) -> (i32, i32) {
    %c0_i32 = arith.constant 0 : i32
    %c0_i32_0 = arith.constant 0 : i32
    return %c0_i32, %arg0 : i32, i32
  }
}

</mosaic_0001>

<bundles_post_ra>
// kernel: _norm_se3_call.1
= control target key start
LH: loop header
LB: loop body
LE: loop exit
PB: predicated region body
PF: predicated region fallthrough
CT: control target
= control target key end

     0   :  { %s1575_s0 = inlined_call_operand.hbm [shape: f32[4,300], index: 0, kind: input, shape index: {}]   ;;  %s1576_s1 = inlined_call_operand.hbm [shape: f32[12,300], index: 1, kind: input, shape index: {}]   ;;  %s1577_s2 = inlined_call_operand.hbm [shape: f32[20,300], index: 2, kind: input, shape index: {}]   ;;  %s1578_s3 = inlined_call_operand.vmem [shape: f32[4,3], index: 3, kind: input, shape index: {}]   ;;  %s1579_s4 = inlined_call_operand.vmem [shape: f32[4,3], index: 4, kind: input, shape index: {}]   ;;  %s1580_s5 = inlined_call_operand.hbm [shape: f32[4,300], index: 5, kind: output, shape index: {0}]   ;;  %s1581_s6 = inlined_call_operand.hbm [shape: f32[12,300], index: 6, kind: output, shape index: {1}]   ;;  %s1582_s7 = inlined_call_operand.hbm [shape: f32[20,300], index: 7, kind: output, shape index: {2}]  }
   0x1   :  { %1593 = sst [smem:[#allocation19_spill]] %s1576_s1 }
   0x2   :  { %13 = vsyncpa [#allocation3], 0 }
   0x3   :  { %15 = vsyncpa [#allocation3 + $0x1], 0 }
   0x4   :  { %16 = vsyncpa [#allocation6], 0 }
   0x5   :  { %18 = vsyncpa [#allocation6 + $0x1], 0 }
   0x6   :  { %19 = vsyncpa [#allocation4], 0 }
   0x7   :  { %21 = vsyncpa [#allocation4 + $0x1], 0 }
   0x8   :  { %22 = vsyncpa [#allocation10], 0 }
   0x9   :  { %24 = vsyncpa [#allocation10 + $0x1], 0  ;;  %s1169_s24 = smov 0   ;;  %s1171_s25 = smov 0  }
   0xa   :  { %s1173_s26 = smov 0   ;;  %s1175_s27 = smov 0  }
   0xb LB: > { %1594 = sst [smem:[#allocation16_spill]] %s1108_s26  ;;  %s1190_s28 = sadd.s32 4294967295, %s1112_s27   ;;  %s1112_s27 = sphi %s1175_s27, %s1613_s27   ;;  %s1108_s26 = sphi %s1173_s26, %s1615_s26   ;;  %s1104_s25 = sphi %s1171_s25, %s1617_s25   ;;  %s1100_s24 = sphi %s1169_s24, %s1616_s24  }
   0xc   : > { %s1583_s29 = sadd.s32 4294967294, %s1112_s27   ;;  %s1194_s30 = sadd.s32 1, %s1112_s27  }
   0xd   : > { %1595 = sst [smem:[#allocation17_spill]] %s1194_s30  ;;  %s37_s8 = sadd.s32 1, %s1108_s26 }
   0xe   : > { %s34_s9 = ssub.s32 %s1112_s27, %s1194_s30  ;;  %p44_p0 = scmp.ne.s32.totalorder %s1108_s26, %s1104_s25 }
   0xf   : > { %p35_p1 = scmp.eq.s32.totalorder %s34_s9, 0  ;;  %p45_p2 = scmp.eq.s32.totalorder %s1112_s27, 0 }
  0x10   : > { %p50_p3 = scmp.ne.s32.totalorder %s1104_s25, %s1100_s24  ;;  %p51_p4 = scmp.eq.s32.totalorder %s1190_s28, 0 }
  0x11   : > { %s1206_s10 = scalar_select %p35_p1, %s1108_s26, %s37_s8  }
  0x12   : > { %p46_p5 = por %p45_p2, %p44_p0  ;;  %p1208_p6 = por %p51_p4, %p50_p3 }
  0x13   : > { %1596 = sst [smem:[#allocation18_spill]] %s1206_s10  ;;  %p168_p7 = scmp.eq.s32.totalorder %s1190_s28, 2 }
  0x14   : > { %s1597_s11 = scalar_select %p1208_p6, 1, 0 }
  0x15   : > { %p174_p8 = scmp.eq.s32.totalorder %s1583_s29, 2  ;;  %p830_p9 = scmp.lt.s32.totalorder %s1112_s27, 3 }
  0x16   : > { %p1216_p10 = por %p168_p7, %p44_p0  ;;  %s1225_s14 = sand.u32 1, %s1108_s26  }
  0x17   : > { %p1220_p11 = por %p174_p8, %p50_p3  ;;  %p1227_p12 = pnand %p830_p9, %p46_p5 }
  0x18   : > { %s1598_s12 = scalar_select %p1216_p10, 1, 0 }
  0x19   : > { %s1599_s13 = scalar_select %p1220_p11, 1, 0 }
  0x1a   : > { %s270_s16 = sand.u32 1, %s1112_s27   ;;  %s781_s17 = sshll.u32 %s1225_s14, 4 }
  0x1b   : > { %s1584_s18 = sshll.u32 %s1112_s27, 7  ;;  %s1601_s1 = sld [smem:[#allocation19_spill]] }
  0x1c   : > { %s274_s22 = scalar_lea.vmem [#allocation5], %s781_s17  ;;  %s1243_s8 = scalar_lea.sflag [#allocation6], %s270_s16 }
  0x1d   : > { %s280_s23 = sshll.u32 %s274_s22, 4  ;;  %p1249_p0 = pneg %p1227_p12  ;;  %s1241_s23 = int_to_ptr.vmem [resolvable:$true] %s280_s23 }
  0x21   : > { %s1239_s21 = scalar_lea.hbm %s1601_s1, %s1584_s18  ;;  %s897_s17 = scalar_lea.hbm %s1601_s1, 768 }
  0x22   : > { %s892_s9 = scalar_lea.hbm %s1239_s21, 256  ;;  %p898_p3 = scmp.lt.u32.totalorder %s1239_s21, %s1601_s1 }
  0x23   : > { %p893_p13 = scmp.ne.s32.totalorder %s1239_s21, %s892_s9  ;;  %p899_p4 = scmp.lt.u32.totalorder %s897_s17, %s892_s9 }
  0x24   : > { %p901_p7 = scmp.lt.u32.totalorder %s892_s9, %s1239_s21 }
  0x25   : > { %p895_p1 = pnand %p1249_p0, %p893_p13  ;;  %p900_p5 = por %p899_p4, %p898_p3 }
  0x27   : > { %p896_p2 = pneg %p895_p1  ;;  %p902_p8 = por %p901_p7, %p900_p5 }
  0x29   : > { %p903_p9 = pnand %p902_p8, %p896_p2 }
  0x2b   : > { %906 = shalt.err (!%p903_p9)
}
  0x2c   : > { %s907_s16 = scalar_lea.vmem %s1241_s23, 256  ;;  %s1114_s19 = smov [#allocation5]  }
  0x2d   : > { %p908_p13 = scmp.ne.s32.totalorder %s1241_s23, %s907_s16  ;;  %s912_s20 = sshll.u32 %s1114_s19, 4  ;;  %s913_s20 = int_to_ptr.vmem [resolvable:$false] %s912_s20 }
  0x2e   : > { %s914_s18 = scalar_lea.vmem %s913_s20, 512  ;;  %p915_p10 = scmp.lt.s32.totalorder %s1241_s23, %s913_s20 }
  0x2f   : > { %p910_p1 = pnand %p908_p13, %p1249_p0  ;;  %p916_p6 = scmp.lt.s32.totalorder %s914_s18, %s907_s16 }
  0x31   : > { %p911_p11 = pneg %p910_p1  ;;  %p917_p3 = por %p916_p6, %p915_p10 }
  0x33   : > { %p918_p4 = pnand %p917_p3, %p911_p11 }
  0x35   : > { %921 = shalt.err (!%p918_p4)
}
  0x36   : > { %s1590_s9 = smov 384   ;;  %s1591_s17 = smov 128  }
  0x37   : > { %s1592_s22 = smov 8   ;;  %p784_p6 = scmp.ge.s32.totalorder %s1112_s27, 1 }
  0x38   : > { %816 = dma.hbm_to_vmem [thread:$0]  (!%p1227_p12), %s1239_s21, 256, %s1241_s23, %s1243_s8, %s1590_s9, %s1591_s17, %s1592_s22  }
  0x39   : > { %p308_p10 = scmp.lt.s32.totalorder %s1112_s27, 4  ;;  %s779_s16 = sshll.u32 %s1225_s14, 2 }
  0x3a   : > { %s780_s19 = sshll.u32 %s1112_s27, 6  ;;  %s256_s26 = scalar_lea.vmem [#allocation2], %s779_s16 }
  0x3b   : > { %p1280_p11 = pnand %p784_p6, %p308_p10  ;;  %s1287_s10 = scalar_lea.hbm %s1575_s0, %s780_s19 }
  0x3c   : > { %s263_s30 = sshll.u32 %s256_s26, 4  ;;  %s796_s21 = smul.u32 24, %s1225_s14  ;;  %s1289_s30 = int_to_ptr.vmem [resolvable:$true] %s263_s30 }
  0x3d   : > { %s1603_s20 = scalar_select %p1280_p11, 1, 0 }
  0x3e   : > { %s253_s23 = scalar_lea.sflag [#allocation3], %s1225_s14  ;;  %s922_s9 = scalar_lea.hbm %s1287_s10, 64 }
  0x3f   : > { %p923_p2 = scmp.ne.s32.totalorder %s1287_s10, %s922_s9  ;;  %s927_s1 = scalar_lea.hbm %s1575_s0, 192 }
  0x40   : > { %p928_p8 = scmp.lt.u32.totalorder %s1287_s10, %s1575_s0  ;;  %p929_p9 = scmp.lt.u32.totalorder %s927_s1, %s922_s9 }
  0x41   : > { %p925_p5 = pnand %p923_p2, %p1249_p0  ;;  %p931_p1 = scmp.lt.u32.totalorder %s922_s9, %s1287_s10 }
  0x42   : > { %p930_p13 = por %p929_p9, %p928_p8 }
  0x43   : > { %p926_p7 = pneg %p925_p5 }
  0x44   : > { %p932_p3 = por %p931_p1, %p930_p13 }
  0x46   : > { %p933_p4 = pnand %p932_p3, %p926_p7 }
  0x48   : > { %936 = shalt.err (!%p933_p4)
}
  0x49   : > { %s937_s26 = scalar_lea.vmem %s1289_s30, 64  ;;  %s1118_s17 = smov [#allocation2]  }
  0x4a   : > { %p938_p6 = scmp.ne.s32.totalorder %s1289_s30, %s937_s26  ;;  %s942_s22 = sshll.u32 %s1118_s17, 4  ;;  %s943_s22 = int_to_ptr.vmem [resolvable:$false] %s942_s22 }
  0x4b   : > { %s944_s16 = scalar_lea.vmem %s943_s22, 128  ;;  %p945_p5 = scmp.lt.s32.totalorder %s1289_s30, %s943_s22 }
  0x4c   : > { %p940_p10 = pnand %p938_p6, %p1249_p0  ;;  %p946_p11 = scmp.lt.s32.totalorder %s944_s16, %s937_s26 }
  0x4e   : > { %p941_p2 = pneg %p940_p10  ;;  %p947_p8 = por %p946_p11, %p945_p5 }
  0x50   : > { %p948_p9 = pnand %p947_p8, %p941_p2 }
  0x52   : > { %951 = shalt.err (!%p948_p9)
}
  0x53   : > { %813 = dma.hbm_to_vmem [thread:$0]  (!%p1227_p12), %s1287_s10, 64, %s1289_s30, %s253_s23  }
  0x54   : > { %s1604_s9 = sshll.u32 %s1112_s27, 7  ;;  %s294_s26 = scalar_lea.vmem [#allocation7], %s796_s21 }
  0x55   : > { %s1319_s18 = scalar_lea.hbm %s1577_s2, %s1604_s9  ;;  %s300_s17 = sshll.u32 %s294_s26, 4  ;;  %s1323_s17 = int_to_ptr.vmem [resolvable:$true] %s300_s17 }
  0x56   : > { %s952_s22 = scalar_lea.hbm %s1319_s18, 384  ;;  %s957_s23 = scalar_lea.hbm %s1577_s2, 1152 }
  0x57   : > { %p953_p11 = scmp.ne.s32.totalorder %s1319_s18, %s952_s22  ;;  %p958_p1 = scmp.lt.u32.totalorder %s1319_s18, %s1577_s2 }
  0x58   : > { %p959_p3 = scmp.lt.u32.totalorder %s957_s23, %s952_s22  ;;  %p961_p6 = scmp.lt.u32.totalorder %s952_s22, %s1319_s18 }
  0x59   : > { %p955_p7 = pnand %p953_p11, %p1249_p0 }
  0x5a   : > { %p960_p4 = por %p959_p3, %p958_p1 }
  0x5b   : > { %p956_p13 = pneg %p955_p7 }
  0x5c   : > { %p962_p10 = por %p961_p6, %p960_p4 }
  0x5e   : > { %p963_p2 = pnand %p962_p10, %p956_p13 }
  0x60   : > { %966 = shalt.err (!%p963_p2)
}
  0x61   : > { %s967_s14 = scalar_lea.vmem %s1323_s17, 384  ;;  %s1119_s21 = smov [#allocation7]  }
  0x62   : > { %p968_p5 = scmp.ne.s32.totalorder %s1323_s17, %s967_s14  ;;  %s972_s1 = sshll.u32 %s1119_s21, 4  ;;  %s973_s1 = int_to_ptr.vmem [resolvable:$false] %s972_s1 }
  0x63   : > { %s974_s19 = scalar_lea.vmem %s973_s1, 768  ;;  %p975_p11 = scmp.lt.s32.totalorder %s1323_s17, %s973_s1 }
  0x64   : > { %p970_p8 = pnand %p968_p5, %p1249_p0  ;;  %p976_p7 = scmp.lt.s32.totalorder %s974_s19, %s967_s14 }
  0x66   : > { %p971_p9 = pneg %p970_p8  ;;  %p977_p1 = por %p976_p7, %p975_p11 }
  0x68   : > { %p978_p3 = pnand %p977_p1, %p971_p9 }
  0x6a   : > { %981 = shalt.err (!%p978_p3)
}
  0x6b   : > { %s1605_s26 = smov 8   ;;  %s1606_s22 = smov 128  }
  0x6c   : > { %s1607_s30 = smov 384   ;;  %p1608_p0 = scmp.ne.s32.totalorder %s1603_s20, 0 }
  0x6d   : > { %819 = dma.hbm_to_vmem [thread:$0]  (!%p1227_p12), %s1319_s18, 384, %s1323_s17, %s1243_s8, %s1607_s30, %s1606_s22, %s1605_s26  }
  0x6e   : > { %312 = sbr.rel (%p1608_p0) target bundleno = 328 (0x148), region = 40  ;;  %s1353_s29 = sand.u32 (!%p1608_p0), 1, %s1104_s25  }
  0x6f   : > { %s785_s10 = sshll.u32 (!%p1608_p0), %s1353_s29, 2  ;;  %s315_s23 = scalar_lea.sflag (!%p1608_p0), [#allocation3], %s1353_s29 }
  0x70   : > { %s1359_s15 = scalar_lea.vmem (!%p1608_p0), [#allocation2], %s785_s10  ;;  %p1609_p13 = scmp.ne.s32.totalorder (!%p1608_p0), %s1597_s11, 0 }
  0x75   : > { %1083 = dma.done.wait (%p1609_p13), %s315_s23, 64  }
  0x76   : > { %1085 = vsyncadd (%p1609_p13), %s315_s23, 4294967232  ;;  %s323_s8 = sand.u32 1, %s1190_s28   ;;  %s786_s20 = sshll.u32 %s1353_s29, 4 }
  0x77   : > { %s324_s18 = scalar_lea.sflag [#allocation6], %s323_s8  ;;  %s327_s17 = scalar_lea.vmem [#allocation5], %s786_s20 }
  0x78   : > { %1087 = dma.done.wait (%p1609_p13), %s324_s18, 640  }
  0x79   : > { %1089 = vsyncadd (%p1609_p13), %s324_s18, 4294966656  ;;  %v1120_v0 = vmov 1   ;;  %s797_s16 = smul.u32 24, %s1353_s29  ;;  %v388_v1 = vld [vmem:[%s1579_s4] sm:$0xf]  ;;  %v1382_v3 = vld [vmem:[%s327_s17] sm:$0xff] }
  0x7a   : > { %875 = vset.pattern.permute.xlu1 %v1120_v0  ;;  %873 = vset.pattern.permute.xlu0 %v1120_v0  ;;  %v387_v2 = vld [vmem:[%s1578_s3] sm:$0xf]  ;;  %v435_v4 = vmul.f32 %v1382_v3, %v1382_v3  ;;  %v1121_v9 = vmov 2   ;;  %v1122_v16 = vmov 0   ;;  %vm394_vm0 = vcmask 1043456   ;;  %s379_s19 = scalar_lea.vmem [#allocation9], %s786_s20 }
  0x7b   : > { %472 = vperm.xlu1 %875, %v388_v1   ;;  %467 = vperm.xlu0 %873, %v387_v2   ;;  %s336_s11 = scalar_lea.vmem [#allocation7], %s797_s16  ;;  %v1394_v11 = vld [vmem:[%s327_s17 + $0x8] sm:$0xf]  ;;  %v1405_v25 = vld [vmem:[%s1359_s15] sm:$0xf]  ;;  %s584_s26 = sshll.u32 %s379_s19, 4  ;;  %s1429_s26 = int_to_ptr.vmem [resolvable:$true] %s584_s26 }
  0x7c   : > { %v1388_v5 = vld [vmem:[%s336_s11] sm:$0xff]  ;;  %v1392_v7 = vld [vmem:[%s336_s11 + $0x8] sm:$0xff]  ;;  %v438_v10 = vrot.slane %v435_v4, 4  ;;  %v436_v14 = vmul.f32 %v1394_v11, %v1394_v11  ;;  %v1400_v19 = vld [vmem:[%s336_s11 + $0x10] sm:$0xf]  ;;  %v390_v27 = vmul.f32 %v1405_v25, %v1405_v25  ;;  %s792_s22 = sshll.u32 %s1190_s28, 7 }
  0x7d   : > { %v489_v6 = vmul.f32 %v1388_v5, %v1388_v5  ;;  %v490_v12 = vmul.f32 %v1392_v7, %v1392_v7  ;;  %v491_v21 = vmul.f32 %v1400_v19, %v1400_v19  ;;  %s1437_s15 = scalar_lea.hbm %s1581_s6, %s792_s22  ;;  %s1443_s20 = scalar_lea.vmem [#allocation11], %s797_s16 }
  0x7e   : > { %v440_v15 = vadd.f32 %v438_v10, %v435_v4  ;;  %v391_v28 = vmax.f32 %v390_v27, 3.5527137e-15  ;;  %s599_s18 = sshll.u32 %s1443_s20, 4  ;;  %s1449_s17 = scalar_lea.sflag [#allocation10], %s323_s8  ;;  %s1486_s18 = int_to_ptr.vmem [resolvable:$true] %s599_s18 }
  0x7f   : > { %v493_v8 = vrot.slane %v489_v6, 4  ;;  %876 = vset.pattern.permute.xlu1 %v1121_v9  ;;  %874 = vset.pattern.permute.xlu0 %v1121_v9  ;;  %v498_v18 = vrot.slane %v490_v12, 4  ;;  %s982_s9 = scalar_lea.vmem %s1429_s26, 256  ;;  %p1610_p4 = scmp.ne.s32.totalorder %s1598_s12, 0 }
  0x80   : > { %532 = vperm.xlu1 %876, %v388_v1   ;;  %527 = vperm.xlu0 %874, %v387_v2   ;;  %v441_v20 = vadd.f32 %v440_v15, %v436_v14  ;;  %p983_p12 = scmp.ne.s32.totalorder %s1429_s26, %s982_s9  ;;  %s1123_s14 = smov [#allocation9]  }
  0x81   : > { %v495_v13 = vadd.f32 %v493_v8, %v489_v6  ;;  %s986_s21 = sshll.u32 %s1123_s14, 4  ;;  %s987_s21 = int_to_ptr.vmem [resolvable:$false] %s986_s21 }
  0x82   : > { %v442_v23 = vmax.f32 %v441_v20, 3.5527137e-15  ;;  %p984_p6 = pnand %p983_p12, %p1610_p4  ;;  %s988_s1 = scalar_lea.vmem %s987_s21, 512 }
  0x83   : > { %v496_v17 = vadd.f32 %v495_v13, %v490_v12  ;;  %p989_p2 = scmp.lt.s32.totalorder %s1429_s26, %s987_s21  ;;  %p990_p5 = scmp.lt.s32.totalorder %s988_s1, %s982_s9 }
  0x84   : > { %877 = vset.pattern.permute.xlu1 %v1122_v16  ;;  %878 = vset.pattern.permute.xlu0 %v1122_v16  ;;  %880 = vrsqrt.f32 %v442_v23  ;;  %p985_p10 = pneg %p984_p6 }
  0x85   : > { %419 = vperm.xlu1 %877, %v387_v2   ;;  %425 = vperm.xlu0 %878, %v388_v1   ;;  %v500_v22 = vadd.f32 %v498_v18, %v496_v17  ;;  %p991_p8 = por %p990_p5, %p989_p2 }
  0x87   : > { %v501_v24 = vadd.f32 %v500_v22, %v491_v21  ;;  %p992_p9 = pnand %p991_p8, %p985_p10 }
  0x89   : > { %879 = vset.pattern.permute.xlu0 %v1121_v9  ;;  %v502_v26 = vmax.f32 %v501_v24, 3.5527137e-15 }
  0x8b   : > { %882 = vrsqrt.f32 %v502_v26 }
  0x8c   : > { %884 = vrsqrt.f32 %v391_v28 }
  0x8e   : > { %v1409_v29 = vpop.eup %880 }
  0x8f   : > { %v444_v30 = vmul.f32 %v1409_v29, %v442_v23 }
  0x91   : > { %v445_v32 = vsel %vm394_vm0, %v444_v30, 0.0 }
  0x92   : > { %v446_v35 = vrot.slane %v445_v32, 4 }
  0x94   : > { %v447_v38 = vadd.f32 %v446_v35, %v445_v32 }
  0x95   : > { %v1412_v31 = vpop.eup %882 }
  0x96   : > { %v504_v33 = vmul.f32 %v1412_v31, %v502_v26  ;;  %v1416_v34 = vpop.eup %884  ;;  %v448_v41 = vrot.slane %v447_v38, 2 }
  0x97   : > { %v393_v37 = vmul.f32 %v1416_v34, %v391_v28 }
  0x98   : > { %v505_v36 = vsel %vm394_vm0, %v504_v33, 0.0  ;;  %v449_v44 = vadd.f32 %v448_v41, %v447_v38 }
  0x99   : > { %v506_v39 = vrot.slane %v505_v36, 4  ;;  %v395_v40 = vsel %vm394_vm0, %v393_v37, 0.0 }
  0x9a   : > { %v396_v43 = vrot.slane %v395_v40, 4  ;;  %v450_v47 = vrot.slane %v449_v44, 1 }
  0x9b   : > { %v507_v42 = vadd.f32 %v506_v39, %v505_v36 }
  0x9c   : > { %v397_v46 = vadd.f32 %v396_v43, %v395_v40  ;;  %v451_v50 = vadd.f32 %v450_v47, %v449_v44 }
  0x9d   : > { %v508_v45 = vrot.slane %v507_v42, 2 }
  0x9e   : > { %v398_v49 = vrot.slane %v397_v46, 2  ;;  %v452_v53 = vmul.f32 0.25, %v451_v50 }
  0x9f   : > { %v509_v48 = vadd.f32 %v508_v45, %v507_v42 }
  0xa0   : > { %v399_v52 = vadd.f32 %v398_v49, %v397_v46  ;;  %v453_v56 = vsub.f32 %v444_v30, %v452_v53 }
  0xa1   : > { %v510_v51 = vrot.slane %v509_v48, 1 }
  0xa2   : > { %v400_v55 = vrot.slane %v399_v52, 1  ;;  %v454_v59 = vmul.f32 %v453_v56, %v453_v56 }
  0xa3   : > { %v511_v54 = vadd.f32 %v510_v51, %v509_v48 }
  0xa4   : > { %v401_v58 = vadd.f32 %v400_v55, %v399_v52  ;;  %v455_v62 = vsel %vm394_vm0, %v454_v59, 0.0 }
  0xa5   : > { %v512_v57 = vmul.f32 0.25, %v511_v54  ;;  %v456_v1 = vrot.slane %v455_v62, 4 }
  0xa6   : > { %v403_v61 = vmul.f32 0.25, %v401_v58 }
  0xa7   : > { %v513_v60 = vsub.f32 %v504_v33, %v512_v57  ;;  %v457_v6 = vadd.f32 %v456_v1, %v455_v62 }
  0xa8   : > { %v404_v0 = vsub.f32 %v393_v37, %v403_v61 }
  0xa9   : > { %v514_v63 = vmul.f32 %v513_v60, %v513_v60  ;;  %v458_v10 = vrot.slane %v457_v6, 2 }
  0xaa   : > { %v405_v4 = vmul.f32 %v404_v0, %v404_v0 }
  0xab   : > { %v515_v2 = vsel %vm394_vm0, %v514_v63, 0.0  ;;  %v459_v14 = vadd.f32 %v458_v10, %v457_v6 }
  0xac   : > { %v516_v8 = vrot.slane %v515_v2, 4  ;;  %v406_v9 = vsel %vm394_vm0, %v405_v4, 0.0 }
  0xad   : > { %v407_v13 = vrot.slane %v406_v9, 4  ;;  %v460_v17 = vrot.slane %v459_v14, 1 }
  0xae   : > { %v517_v12 = vadd.f32 %v516_v8, %v515_v2 }
  0xaf   : > { %v408_v16 = vadd.f32 %v407_v13, %v406_v9  ;;  %v461_v21 = vadd.f32 %v460_v17, %v459_v14 }
  0xb0   : > { %v518_v15 = vrot.slane %v517_v12, 2 }
  0xb1   : > { %v409_v20 = vrot.slane %v408_v16, 2  ;;  %v462_v24 = vmul.f32 0.25, %v461_v21 }
  0xb2   : > { %v519_v18 = vadd.f32 %v518_v15, %v517_v12 }
  0xb3   : > { %v410_v23 = vadd.f32 %v409_v20, %v408_v16  ;;  %v463_v28 = vadd.f32 1e-05, %v462_v24 }
  0xb4   : > { %v520_v22 = vrot.slane %v519_v18, 1 }
  0xb5   : > { %v411_v27 = vrot.slane %v410_v23, 1  ;;  %886 = vrsqrt.f32 %v463_v28 }
  0xb6   : > { %v521_v26 = vadd.f32 %v520_v22, %v519_v18 }
  0xb7   : > { %v412_v32 = vadd.f32 %v411_v27, %v410_v23 }
  0xb8   : > { %v522_v30 = vmul.f32 0.25, %v521_v26 }
  0xb9   : > { %v413_v35 = vmul.f32 0.25, %v412_v32 }
  0xba   : > { %v523_v33 = vadd.f32 1e-05, %v522_v30 }
  0xbb   : > { %v414_v36 = vadd.f32 1e-05, %v413_v35 }
  0xbc   : > { %888 = vrsqrt.f32 %v523_v33 }
  0xbd   : > { %890 = vrsqrt.f32 %v414_v36 }
  0xbf   : > { %v887_v37 = vpop.eup %886 }
  0xc0   : > { %v465_v38 = vmul.f32 %v887_v37, %v453_v56 }
  0xc6   : > { %v889_v39 = vpop.eup %888 }
  0xc7   : > { %v525_v43 = vmul.f32 %v889_v39, %v513_v60  ;;  %v891_v45 = vpop.eup %890 }
  0xc8   : > { %v416_v51 = vmul.f32 %v891_v45, %v404_v0 }
  0xfa   : > { %v473_v40 = vpop.permute.xlu1 %472  ;;  %v468_v41 = vpop.permute.xlu0 %467 }
  0xfb   : > { %v470_v42 = vmul.f32 %v468_v41, %v465_v38 }
  0xfd   : > { %v475_v44 = vadd.f32 %v473_v40, %v470_v42 }
  0xff   : > { %v476_v46 = vmax.f32 %v475_v44, 0.0  ;;  %v533_v47 = vpop.permute.xlu1 %532  ;;  %v528_v48 = vpop.permute.xlu0 %527 }
 0x100   : > { %v530_v49 = vmul.f32 %v528_v48, %v525_v43 }
 0x101   : > { %v477_v50 = vmul.f32 %v1409_v29, %v476_v46 }
 0x102   : > { %v535_v52 = vadd.f32 %v533_v47, %v530_v49 }
 0x103   : > { %v479_v53 = vrot.slane %v477_v50, 4  ;;  %v483_v54 = vmul.f32 %v477_v50, %v1394_v11 }
 0x104   : > { %v536_v55 = vmax.f32 %v535_v52, 0.0  ;;  %v420_v56 = vpop.permute.xlu1 %419  ;;  %v426_v57 = vpop.permute.xlu0 %425 }
 0x105   : > { %v481_v58 = vsel %vm394_vm0, %v477_v50, %v479_v53  ;;  %485 = vst [vmem:[%s379_s19 + $0x8] sm:$0xf] %v483_v54  ;;  %v422_v29 = vmul.f32 %v420_v56, %v416_v51 }
 0x106   : > { %v482_v11 = vmul.f32 %v481_v58, %v1382_v3  ;;  %v537_v59 = vmul.f32 %v1412_v31, %v536_v55 }
 0x107   : > { %v428_v60 = vadd.f32 %v426_v57, %v422_v29 }
 0x108   : > { %484 = vst [vmem:[%s379_s19] sm:$0xff] %v482_v11  ;;  %v539_v61 = vrot.slane %v537_v59, 4  ;;  %v544_v62 = vmul.f32 %v537_v59, %v1400_v19 }
 0x109   : > { %v429_v63 = vmax.f32 %v428_v60, 0.0 }
 0x10a   : > { %995 = shalt.err (!%p992_p9)
}
 0x10b   : > { %s996_s8 = scalar_lea.hbm %s1437_s15, 256  ;;  %s1000_s19 = scalar_lea.hbm %s1581_s6, 768 }
 0x10c   : > { %p997_p11 = scmp.ne.s32.totalorder %s1437_s15, %s996_s8  ;;  %p1001_p3 = scmp.lt.u32.totalorder %s1437_s15, %s1581_s6 }
 0x10d   : > { %p1002_p0 = scmp.lt.u32.totalorder %s1000_s19, %s996_s8  ;;  %p1004_p12 = scmp.lt.u32.totalorder %s996_s8, %s1437_s15 }
 0x10e   : > { %p998_p7 = pnand %p997_p11, %p1610_p4 }
 0x10f   : > { %p1003_p13 = por %p1002_p0, %p1001_p3 }
 0x110   : > { %p999_p1 = pneg %p998_p7 }
 0x111   : > { %p1005_p6 = por %p1004_p12, %p1003_p13 }
 0x113   : > { %p1006_p10 = pnand %p1005_p6, %p999_p1 }
 0x115   : > { %1009 = shalt.err (!%p1006_p10)
}
 0x116   : > { %s1124_s9 = smov 128   ;;  %s1125_s14 = smov 384   ;;  %v541_v3 = vsel %vm394_vm0, %v537_v59, %v539_v61  ;;  %547 = vst [vmem:[%s1443_s20 + $0x10] sm:$0xf] %v544_v62  ;;  %v430_v0 = vmul.f32 %v1416_v34, %v429_v63 }
 0x117   : > { %s1126_s21 = smov 8   ;;  %s791_s1 = sshll.u32 %s1190_s28, 6  ;;  %v542_v19 = vmul.f32 %v541_v3, %v1388_v5  ;;  %v543_v31 = vmul.f32 %v541_v3, %v1392_v7 }
 0x118   : > { %805 = dma.vmem_to_hbm [thread:$0]  (%p1610_p4), %s1429_s26, 256, %s1437_s15, %s1449_s17, %s1124_s9, %s1125_s14, %s1126_s21   ;;  %v431_v1 = vmul.f32 %v430_v0, %v1405_v25 }
 0x119   : > { %s1481_s8 = scalar_lea.vmem [#allocation8], %s785_s10  ;;  %s1496_s10 = scalar_lea.hbm %s1582_s7, %s792_s22  ;;  %545 = vst [vmem:[%s1443_s20] sm:$0xff] %v542_v19  ;;  %546 = vst [vmem:[%s1443_s20 + $0x8] sm:$0xff] %v543_v31 }
 0x11a   : > { %s572_s16 = sshll.u32 %s1481_s8, 4  ;;  %s1504_s30 = scalar_lea.hbm %s1580_s5, %s791_s1  ;;  %s1506_s16 = int_to_ptr.vmem [resolvable:$true] %s572_s16 }
 0x11b   : > { %s1010_s23 = scalar_lea.vmem %s1486_s18, 384  ;;  %s1127_s28 = smov [#allocation11]  }
 0x11c   : > { %p1011_p2 = scmp.ne.s32.totalorder %s1486_s18, %s1010_s23  ;;  %s1014_s26 = sshll.u32 %s1127_s28, 4  ;;  %s1015_s26 = int_to_ptr.vmem [resolvable:$false] %s1014_s26 }
 0x11d   : > { %s1016_s22 = scalar_lea.vmem %s1015_s26, 768  ;;  %p1017_p9 = scmp.lt.s32.totalorder %s1486_s18, %s1015_s26 }
 0x11e   : > { %p1012_p5 = pnand %p1011_p2, %p1610_p4  ;;  %p1018_p11 = scmp.lt.s32.totalorder %s1016_s22, %s1010_s23 }
 0x120   : > { %p1013_p8 = pneg %p1012_p5  ;;  %p1019_p7 = por %p1018_p11, %p1017_p9 }
 0x122   : > { %p1020_p1 = pnand %p1019_p7, %p1013_p8 }
 0x124   : > { %1023 = shalt.err (!%p1020_p1)
}
 0x125   : > { %s1024_s20 = scalar_lea.hbm %s1496_s10, 384  ;;  %s1028_s11 = scalar_lea.hbm %s1582_s7, 1152 }
 0x126   : > { %p1025_p3 = scmp.ne.s32.totalorder %s1496_s10, %s1024_s20  ;;  %p1029_p12 = scmp.lt.u32.totalorder %s1496_s10, %s1582_s7 }
 0x127   : > { %p1030_p6 = scmp.lt.u32.totalorder %s1028_s11, %s1024_s20  ;;  %p1032_p2 = scmp.lt.u32.totalorder %s1024_s20, %s1496_s10 }
 0x128   : > { %p1026_p0 = pnand %p1025_p3, %p1610_p4 }
 0x129   : > { %p1031_p10 = por %p1030_p6, %p1029_p12 }
 0x12a   : > { %p1027_p13 = pneg %p1026_p0 }
 0x12b   : > { %p1033_p5 = por %p1032_p2, %p1031_p10 }
 0x12d   : > { %p1034_p8 = pnand %p1033_p5, %p1027_p13 }
 0x12f   : > { %1037 = shalt.err (!%p1034_p8)
}
 0x130   : > { %806 = dma.vmem_to_hbm [thread:$0]  (%p1610_p4), %s1486_s18, 384, %s1496_s10, %s1449_s17, %s1124_s9, %s1125_s14, %s1126_s21  }
 0x131   : > { %432 = vst [vmem:[%s1481_s8] sm:$0xf] %v431_v1  ;;  %s549_s23 = scalar_lea.sflag [#allocation4], %s1353_s29  ;;  %s1038_s26 = scalar_lea.vmem %s1506_s16, 64 }
 0x132   : > { %p1039_p9 = scmp.ne.s32.totalorder %s1506_s16, %s1038_s26  ;;  %s1128_s22 = smov [#allocation8]  }
 0x133   : > { %s1042_s20 = sshll.u32 %s1128_s22, 4  ;;  %s1043_s20 = int_to_ptr.vmem [resolvable:$false] %s1042_s20 }
 0x134   : > { %p1040_p11 = pnand %p1039_p9, %p1610_p4  ;;  %s1044_s1 = scalar_lea.vmem %s1043_s20, 128 }
 0x135   : > { %p1045_p1 = scmp.lt.s32.totalorder %s1506_s16, %s1043_s20  ;;  %p1046_p3 = scmp.lt.s32.totalorder %s1044_s1, %s1038_s26 }
 0x136   : > { %p1041_p7 = pneg %p1040_p11 }
 0x137   : > { %p1047_p0 = por %p1046_p3, %p1045_p1 }
 0x139   : > { %p1048_p13 = pnand %p1047_p0, %p1041_p7 }
 0x13b   : > { %1051 = shalt.err (!%p1048_p13)
}
 0x13c   : > { %s1052_s29 = scalar_lea.hbm %s1504_s30, 64  ;;  %s1056_s9 = scalar_lea.hbm %s1580_s5, 192 }
 0x13d   : > { %p1053_p12 = scmp.ne.s32.totalorder %s1504_s30, %s1052_s29  ;;  %p1057_p2 = scmp.lt.u32.totalorder %s1504_s30, %s1580_s5 }
 0x13e   : > { %p1058_p5 = scmp.lt.u32.totalorder %s1056_s9, %s1052_s29  ;;  %p1060_p9 = scmp.lt.u32.totalorder %s1052_s29, %s1504_s30 }
 0x13f   : > { %p1054_p6 = pnand %p1053_p12, %p1610_p4 }
 0x140   : > { %p1059_p8 = por %p1058_p5, %p1057_p2 }
 0x141   : > { %p1055_p10 = pneg %p1054_p6 }
 0x142   : > { %p1061_p11 = por %p1060_p9, %p1059_p8 }
 0x144   : > { %p1062_p7 = pnand %p1061_p11, %p1055_p10 }
 0x146   : > { %1065 = shalt.err (!%p1062_p7)
}
 0x147   : > { %804 = dma.vmem_to_hbm [thread:$0]  (%p1610_p4), %s1506_s16, 64, %s1504_s30, %s549_s23  }
 0x148 PF: > { %p831_p1 = scmp.ge.s32.totalorder %s1112_s27, 2  ;;  %s614_s8 = sand.u32 1, %s1100_s24  }
 0x149   : > { %p1611_p3 = scmp.ne.s32.totalorder %s1599_s13, 0  ;;  %s615_s10 = scalar_lea.sflag [#allocation4], %s614_s8 }
 0x14b   : > { %p821_p0 = pnand %p831_p1, %p1611_p3 }
 0x14d   : > { %1091 = dma.done.wait (!%p821_p0), %s615_s10, 64  }
 0x14e   : > { %1093 = vsyncadd (!%p821_p0), %s615_s10, 4294967232  ;;  %s1612_s15 = sadd.s32 4294967294, %s1112_s27  }
 0x14f   : > { %s623_s11 = sand.u32 1, %s1612_s15  }
 0x150   : > { %s624_s19 = scalar_lea.sflag [#allocation10], %s623_s11 }
 0x151   : > { %1095 = dma.done.wait (!%p821_p0), %s624_s19, 640  }
 0x152   : > { %1097 = vsyncadd (!%p821_p0), %s624_s19, 4294966656  ;;  %s1613_s27 = sld [smem:[#allocation17_spill]]  ;;  %s1614_s12 = sld [smem:[#allocation16_spill]] }
 0x153   : > { %s1615_s26 = sld [smem:[#allocation18_spill]]  ;;  %s1616_s24 = smov %s1104_s25 }
 0x158   : > { %p27_p4 = scmp.ge.s32.totalorder %s1613_s27, 5   ;;  %s1617_s25 = smov %s1614_s12 }
 0x15a   :  { %29 = sbr.rel (!%p27_p4) target bundleno = 11 (0xb), region = 141 }
 0x161   :  { %638 = vsyncpa [#allocation3], 1 }
 0x162   :  { %640 = vsyncpa [#allocation3 + $0x1], 1 }
 0x163   :  { %641 = vsyncpa [#allocation6], 1 }
 0x164   :  { %643 = vsyncpa [#allocation6 + $0x1], 1 }
 0x165   :  { %644 = vsyncpa [#allocation4], 1 }
 0x166   :  { %646 = vsyncpa [#allocation4 + $0x1], 1 }
 0x167   :  { %647 = vsyncpa [#allocation10], 1 }
 0x168   :  { %649 = vsyncpa [#allocation10 + $0x1], 1 }

</bundles_post_ra>
